<compile_context>
chip_gen: v7x
topology: tpu7x:2x2x1
jax: 0.10.0
libtpu: 0.0.40
codegen_flags: <defaults>
</compile_context>

<pallas_src>
import jax
import jax.numpy as jnp
from jax.experimental import pallas as pl
from jax.experimental.pallas import tpu as pltpu


_TARGET_BLOCK_BYTES = 4 * 1024 * 1024    # ~4 MiB per block (per perf review)
_MIN_SPLIT_BYTES = 2 * 1024 * 1024       # force >=2 blocks above this (v7x megacore)
_VMEM_LIMIT_BYTES = 40 * 1024 * 1024     # explicit scoped VMEM (in+out+scale, 2 buffers)


def _drop_path_kernel(scale_ref, x_ref, o_ref):
    # scale_ref: (row_tile, 1) f32 — 0.0 (dropped row) or 1/keep_prob (kept row).
    # x_ref / o_ref: (row_tile, lane) lane-dense tile of the flattened batch.
    o_ref[...] = (x_ref[...].astype(jnp.float32) * scale_ref[...]).astype(o_ref.dtype)


def _round_up(a, b):
    return ((a + b - 1) // b) * b


def _plan_rows(r_total, lane, itemsize):
    """Pick (r_pad, row_tile): padded total row count and rows per block."""
    gran = max(8, 32 // itemsize)         # sublane granularity: f32 8, bf16 16, int8 32
    row_bytes = lane * itemsize
    total_bytes = r_total * row_bytes
    if r_total % gran != 0:
        if total_bytes <= _TARGET_BLOCK_BYTES:
            # Single bounded full-extent block (legal: block dim == array dim).
            return r_total, r_total
        r_pad = _round_up(r_total, gran)  # rare: pad rows so they tile cleanly
    else:
        r_pad = r_total
    max_rows = max(gran, _TARGET_BLOCK_BYTES // row_bytes)
    if r_pad * row_bytes > _MIN_SPLIT_BYTES:
        # Keep both v7x TensorCores busy: at least 2 blocks when data is non-trivial.
        max_rows = min(max_rows, max(gran, r_pad // 2))
    row_tile = gran
    d = gran
    limit = min(r_pad, max_rows)
    while d <= limit:
        if r_pad % d == 0:
            row_tile = d
        d += gran
    return r_pad, row_tile


def drop_path(x, rand_u, drop_prob: float = 0.0, training: bool = False):
    """Pallas DropPath. x: (B, ...); rand_u: (B,) uniforms in [0, 1)."""
    if drop_prob == 0.0 or not training:
        return x
    keep_prob = 1.0 - drop_prob
    B = x.shape[0]
    orig_shape = x.shape
    n = 1
    for d in x.shape[1:]:
        n *= d
    itemsize = jnp.dtype(x.dtype).itemsize

    # Per-sample scale (B scalars of plain-JAX glue, f32): 0.0 or 1/keep_prob,
    # matching floor(keep_prob + U[0,1)) / keep_prob from the PyTorch reference.
    scale = jnp.floor(jnp.float32(keep_prob) + rand_u.reshape(B).astype(jnp.float32)) * \
        jnp.float32(1.0 / keep_prob)                                  # (B,)

    # Lane-dense layout: lane = largest 128-multiple dividing n, else pad to 128.
    lane = next((c for c in (1024, 512, 256, 128) if n % c == 0), 128)
    n_pad = _round_up(n, lane)
    rows_ps = n_pad // lane                                           # rows per sample
    r_total = B * rows_ps

    r_pad, row_tile = _plan_rows(r_total, lane, itemsize)

    # Flatten batch+features into one lane-dense (rows, lane) slab; the per-sample
    # scale becomes a per-row (rows, 1) f32 vector (broadcast in-kernel over lanes).
    x2 = x.reshape(B, n)
    if n_pad != n:
        x2 = jnp.pad(x2, ((0, 0), (0, n_pad - n)))
    xr = x2.reshape(r_total, lane)
    scale_rows = jnp.broadcast_to(scale.reshape(B, 1), (B, rows_ps)).reshape(r_total, 1)
    if r_pad != r_total:
        xr = jnp.pad(xr, ((0, r_pad - r_total), (0, 0)))
        scale_rows = jnp.pad(scale_rows, ((0, r_pad - r_total), (0, 0)))

    grid = (r_pad // row_tile,)
    out_r = pl.pallas_call(
        _drop_path_kernel,
        out_shape=jax.ShapeDtypeStruct((r_pad, lane), x.dtype),
        grid=grid,
        in_specs=[
            pl.BlockSpec((row_tile, 1), lambda t: (t, 0)),        # per-row scale (f32)
            pl.BlockSpec((row_tile, lane), lambda t: (t, 0)),     # x tile
        ],
        out_specs=pl.BlockSpec((row_tile, lane), lambda t: (t, 0)),
        compiler_params=pltpu.CompilerParams(
            dimension_semantics=("parallel",),
            vmem_limit_bytes=_VMEM_LIMIT_BYTES),
    )(scale_rows, xr)

    out2 = out_r[:r_total].reshape(B, n_pad)
    if n_pad != n:
        out2 = out2[:, :n]
    return out2.reshape(orig_shape)


def drop_path_reference(x, rand_u, drop_prob: float, training: bool):
    # Pure-JAX reference mirroring the PyTorch drop_path_f exactly (f32 inputs).
    if drop_prob == 0.0 or not training:
        return x
    keep_prob = 1.0 - drop_prob
    shape = (x.shape[0],) + (1,) * (x.ndim - 1)
    random_tensor = jnp.floor(keep_prob + rand_u.reshape(shape).astype(x.dtype))
    return (x / keep_prob) * random_tensor


if __name__ == "__main__":
    key = jax.random.PRNGKey(0)
    kx, kr, kx2, kr2, kx3, kr3, kx4, kr4 = jax.random.split(key, 8)

    drop_prob = 0.3
    training = True

    # Main case: lane-dense path (C*H*W = 1024, a multiple of 128), f32.
    B, C, H, W = 2, 4, 16, 16
    x = jax.random.normal(kx, (B, C, H, W), dtype=jnp.float32)
    rand_u = jax.random.uniform(kr, (B,), dtype=jnp.float32)  # torch.rand((B,1,1,1)) equiv

    out = jax.block_until_ready(drop_path(x, rand_u, drop_prob, training))
    ref = drop_path_reference(x, rand_u, drop_prob, training)
    assert out.shape == x.shape and out.dtype == x.dtype
    assert jnp.allclose(out, ref, atol=1e-6, rtol=1e-6)

    # Eval / drop_prob==0 fast path (identity).
    out_eval = jax.block_until_ready(drop_path(x, rand_u, drop_prob, training=False))
    assert jnp.allclose(out_eval, x)

    # Padded path: feature size not a multiple of 128 (C*H*W = 588).
    x_odd = jax.random.normal(kx2, (2, 3, 14, 14), dtype=jnp.float32)
    rand_odd = jax.random.uniform(kr2, (2,), dtype=jnp.float32)
    out_odd = jax.block_until_ready(drop_path(x_odd, rand_odd, drop_prob, training))
    ref_odd = drop_path_reference(x_odd, rand_odd, drop_prob, training)
    assert jnp.allclose(out_odd, ref_odd, atol=1e-6, rtol=1e-6)

    # bf16 path (sublane granularity 16; kernel multiplies in f32, casts product).
    x_bf = jax.random.normal(kx3, (2, 4, 16, 16), dtype=jnp.bfloat16)
    rand_bf = jax.random.uniform(kr3, (2,), dtype=jnp.float32)
    out_bf = jax.block_until_ready(drop_path(x_bf, rand_bf, drop_prob, training))
    keep = 1.0 - drop_prob
    scale_bf = jnp.floor(jnp.float32(keep) + rand_bf) / jnp.float32(keep)
    ref_bf = (x_bf.astype(jnp.float32) * scale_bf.reshape(2, 1, 1, 1)).astype(jnp.bfloat16)
    assert out_bf.dtype == jnp.bfloat16
    assert jnp.allclose(out_bf.astype(jnp.float32), ref_bf.astype(jnp.float32))

    # Multi-block path (total > 2 MiB -> grid with >= 2 row blocks).
    x_big = jax.random.normal(kx4, (8, 32, 64, 64), dtype=jnp.float32)
    rand_big = jax.random.uniform(kr4, (8,), dtype=jnp.float32)
    out_big = jax.block_until_ready(drop_path(x_big, rand_big, drop_prob, training))
    ref_big = drop_path_reference(x_big, rand_big, drop_prob, training)
    assert jnp.allclose(out_big, ref_big, atol=1e-6, rtol=1e-6)

    print("KERNEL_OK")
</pallas_src>

<mosaic_0001>
module attributes {stable_mosaic.version = 11 : i64} {
  func.func @_drop_path_kernel(%arg0: i32, %arg1: memref<2x1xf32, #tpu.memory_space<vmem>>, %arg2: memref<2x1024xf32, #tpu.memory_space<vmem>>, %arg3: memref<2x1024xf32, #tpu.memory_space<vmem>>) attributes {dimension_semantics = [#tpu.dimension_semantics<parallel>], iteration_bounds = array<i64: 1>, scalar_prefetch = 0 : i64, scratch_operands = 0 : i64, tpu.core_type = #tpu.core_type<tc>, window_params = [{transform_indices = @transform_0, window_bounds = array<i64: 2, 1>}, {transform_indices = @transform_1, window_bounds = array<i64: 2, 1024>}, {transform_indices = @transform_2, window_bounds = array<i64: 2, 1024>}]} {
    %c0 = arith.constant 0 : index
    %c0_0 = arith.constant 0 : index
    %0 = vector.load %arg2[%c0, %c0_0] : memref<2x1024xf32, #tpu.memory_space<vmem>>, vector<2x1024xf32>
    %c0_1 = arith.constant 0 : index
    %c0_2 = arith.constant 0 : index
    %1 = vector.load %arg1[%c0_1, %c0_2] : memref<2x1xf32, #tpu.memory_space<vmem>>, vector<2x1xf32>
    %2 = vector.broadcast %1 : vector<2x1xf32> to vector<2x1024xf32>
    %3 = arith.mulf %0, %2 : vector<2x1024xf32>
    %c0_3 = arith.constant 0 : index
    %c0_4 = arith.constant 0 : index
    %4 = vector.load %arg3[%c0_3, %c0_4] : memref<2x1024xf32, #tpu.memory_space<vmem>>, vector<2x1024xf32>
    tpu.vector_store %arg3[%c0_3, %c0_4], %3 {strides = array<i32>} : memref<2x1024xf32, #tpu.memory_space<vmem>>, vector<2x1024xf32>,
    return
  }
  func.func @transform_0(%arg0: i32) -> (i32, i32) {
    %c0_i32 = arith.constant 0 : i32
    %c0_i32_0 = arith.constant 0 : i32
    return %arg0, %c0_i32 : i32, i32
  }
  func.func @transform_1(%arg0: i32) -> (i32, i32) {
    %c0_i32 = arith.constant 0 : i32
    %c0_i32_0 = arith.constant 0 : i32
    return %arg0, %c0_i32 : i32, i32
  }
  func.func @transform_2(%arg0: i32) -> (i32, i32) {
    %c0_i32 = arith.constant 0 : i32
    %c0_i32_0 = arith.constant 0 : i32
    return %arg0, %c0_i32 : i32, i32
  }
}

</mosaic_0001>

<bundles_post_ra>
// kernel: tpu_custom_call.1
= control target key start
LH: loop header
LB: loop body
LE: loop exit
PB: predicated region body
PF: predicated region fallthrough
CT: control target
= control target key end

     0   :  { %7 = vsyncpa [#allocation3], 0  ;;  %s157_s0 = inlined_call_operand.vmem [shape: f32[2,1], index: 0, kind: input, shape index: {}]   ;;  %s158_s1 = inlined_call_operand.hbm [shape: f32[2,1024], index: 1, kind: input, shape index: {}]   ;;  %s159_s2 = inlined_call_operand.hbm [shape: f32[2,1024], index: 2, kind: output, shape index: {}]  }
   0x1   :  { %8 = vsyncpa [#allocation4], 0  ;;  %s111_s9 = smov [#allocation2]   ;;  %s63_s13 = scalar_lea.hbm %s158_s1, 256 }
   0x2   :  { %s17_s10 = sshll.u32 %s111_s9, 4  ;;  %p64_p0 = scmp.ne.s32.totalorder %s158_s1, %s63_s13  ;;  %s18_s10 = int_to_ptr.vmem [resolvable:$true] %s17_s10 }
   0x3   :  { %p67_p1 = scmp.lt.u32.totalorder %s63_s13, %s158_s1 }
   0x5   :  { %p69_p2 = pnand %p67_p1, %p64_p0 }
   0x7   :  { %72 = shalt.err (!%p69_p2)
}
   0x8   :  { %s73_s18 = scalar_lea.vmem %s18_s10, 256  ;;  %p78_p4 = scmp.lt.s32.totalorder %s18_s10, %s18_s10 }
   0x9   :  { %p74_p3 = scmp.ne.s32.totalorder %s18_s10, %s73_s18  ;;  %p79_p5 = scmp.lt.s32.totalorder %s73_s18, %s73_s18 }
   0xb   :  { %p80_p6 = por %p79_p5, %p78_p4 }
   0xd   :  { %p81_p7 = pnand %p80_p6, %p74_p3 }
   0xf   :  { %84 = shalt.err (!%p81_p7)
}
  0x10   :  { %20 = dma.hbm_to_vmem [thread:$0]  %s158_s1, 256, %s18_s10, [#allocation3]  }
  0x11   :  { %107 = dma.done.wait [#allocation3], 256  }
  0x12   :  { %108 = vsyncadd [#allocation3], 4294967040  ;;  %v112_v0 = vmov 0   ;;  %v26_v1 = vld [vmem:[%s157_s0] sm:$0x3]  ;;  %v34_v4 = vlaneseq  ;;  %v25_v10 = vld [vmem:[#allocation2 + $0x8] sm:$0xff] }
  0x13   :  { %62 = vset.pattern.permute.xlu0 %v112_v0  ;;  %v113_v2 = vmov 269488144   ;;  %v24_v9 = vld [vmem:[#allocation2] sm:$0xff]  ;;  %s114_s23 = smov [#allocation5]  }
  0x14   :  { %29 = vperm.xlu0 %62, %v26_v1   ;;  %v32_v3 = vunpack.c.l.s4 %v113_v2  ;;  %v35_v6 = vshrl.u32 %v34_v4, 7  ;;  %s49_s1 = sshll.u32 %s114_s23, 4  ;;  %s50_s1 = int_to_ptr.vmem [resolvable:$true] %s49_s1 }
  0x15   :  { %s85_s24 = scalar_lea.vmem %s50_s1, 256  ;;  %p90_p9 = scmp.lt.s32.totalorder %s50_s1, %s50_s1 }
  0x16   :  { %v33_v5 = vunpack.c.0.s8 %v32_v3  ;;  %p86_p8 = scmp.ne.s32.totalorder %s50_s1, %s85_s24  ;;  %p91_p10 = scmp.lt.s32.totalorder %s85_s24, %s85_s24 }
  0x18   :  { %v36_v7 = vsub.s32 %v33_v5, %v35_v6  ;;  %p92_p11 = por %p91_p10, %p90_p9 }
  0x1a   :  { %p93_p12 = pnand %p92_p11, %p86_p8 }
  0x93   :  { %v30_v8 = vpop.permute.xlu0 %29 }
  0x94   :  { %v37_v11 = vrot.slane %v30_v8, %v36_v7 }
  0x96   :  { %v39_v12 = vmul.f32 %v37_v11, %v24_v9  ;;  %v40_v13 = vmul.f32 %v37_v11, %v25_v10 }
  0x98   :  { %41 = vst [vmem:[#allocation5] sm:$0xff] %v39_v12  ;;  %42 = vst [vmem:[#allocation5 + $0x8] sm:$0xff] %v40_v13 }
  0x99   :  { %96 = shalt.err (!%p93_p12)
}
  0x9a   :  { %s97_s26 = scalar_lea.hbm %s159_s2, 256 }
  0x9b   :  { %p98_p13 = scmp.ne.s32.totalorder %s159_s2, %s97_s26  ;;  %p101_p0 = scmp.lt.u32.totalorder %s97_s26, %s159_s2 }
  0x9d   :  { %p103_p1 = pnand %p101_p0, %p98_p13 }
  0x9f   :  { %106 = shalt.err (!%p103_p1)
}
  0xa0   :  { %52 = dma.vmem_to_hbm [thread:$0]  %s50_s1, 256, %s159_s2, [#allocation4]  }
  0xa1   :  { %109 = dma.done.wait [#allocation4], 256  }
  0xa2   :  { %110 = vsyncadd [#allocation4], 4294967040 }
  0xa3   :  { %56 = vsyncpa [#allocation3], 1 }
  0xa4   :  { %57 = vsyncpa [#allocation4], 1 }

</bundles_post_ra>
